<compile_context>
chip_gen: v7x
topology: tpu7x:2x2x1
jax: 0.10.0
libtpu: 0.0.40
codegen_flags: <defaults>
</compile_context>

<pallas_src>
import functools

import jax
import jax.numpy as jnp
from jax.experimental import pallas as pl
from jax.experimental.pallas import tpu as pltpu

LANE = 128                       # lane width; feature dims padded to a multiple
TK_CAP = 2048                    # max K (src) tile for the streamed layer-0 agg
STREAM_VMEM_BUDGET = 24 * 2**20  # budget for the double-buffered A0 / x tiles


def _round_up(x, m):
    return (x + m - 1) // m * m


def _layer0_kernel(a_ref, x_ref, w_ref, b_ref, o_ref, acc_ref, *, apply_relu):
    """One GraphConv layer: o = [relu](A @ x @ W + b), with K-tiled aggregation."""
    k = pl.program_id(1)

    @pl.when(k == 0)
    def _():
        acc_ref[...] = jnp.zeros_like(acc_ref)

    # streamed, normalized-sum aggregation (MXU, f32 accumulation)
    acc_ref[...] += jnp.dot(a_ref[...], x_ref[...],
                            preferred_element_type=jnp.float32)

    @pl.when(k == pl.num_programs(1) - 1)
    def _():
        z = jnp.dot(acc_ref[...].astype(jnp.bfloat16), w_ref[...],
                    preferred_element_type=jnp.float32) + b_ref[...]
        if apply_relu:
            z = jnp.maximum(z, 0.0)
        o_ref[...] = z.astype(o_ref.dtype)          # lane-dense (128-mult) store


def _tail_kernel(*refs, n_tail):
    """Fused layers 1..L-1 (tiny), fully VMEM-resident, single invocation."""
    h_ref = refs[0]
    a_refs = refs[1:1 + n_tail]
    w_refs = refs[1 + n_tail:1 + 2 * n_tail]
    b_refs = refs[1 + 2 * n_tail:1 + 3 * n_tail]
    o_ref = refs[1 + 3 * n_tail]

    h = h_ref[...]                                   # bf16
    for i in range(n_tail):
        agg = jnp.dot(a_refs[i][...], h, preferred_element_type=jnp.float32)
        z = jnp.dot(agg.astype(jnp.bfloat16), w_refs[i][...],
                    preferred_element_type=jnp.float32) + b_refs[i][...]
        if i != n_tail - 1:
            h = jnp.maximum(z, 0.0).astype(jnp.bfloat16)   # stays in VMEM
        else:
            o_ref[...] = z.astype(o_ref.dtype)


def nsgcn_forward(a_blocks, x, weights, biases, n_classes):
    """NSGCN forward with dense symmetric-normalized MFG blocks."""
    n_layers = len(weights)
    assert len(a_blocks) == n_layers and len(biases) == n_layers

    feat = [x.shape[1]] + [w.shape[1] for w in weights]
    feat_pad = [_round_up(f, LANE) for f in feat]
    n_dst = [a.shape[0] for a in a_blocks]
    n_src0 = a_blocks[0].shape[1]
    assert x.shape[0] == n_src0

    def pad2(m, rows, cols):
        return jnp.pad(m, ((0, rows - m.shape[0]), (0, cols - m.shape[1])))

    # ---- tile sizing for the streamed layer-0 aggregation ----
    tm = min(_round_up(n_dst[0], 8), 128)
    dst0_pad = _round_up(n_dst[0], tm)
    per_tk_bytes = 4 * (tm + feat_pad[0])            # bf16, x2 double buffering
    tk = max(LANE, (STREAM_VMEM_BUDGET // per_tk_bytes) // LANE * LANE)
    tk = min(tk, TK_CAP, _round_up(n_src0, LANE))
    src0_pad = _round_up(n_src0, tk)

    # ---- host-side layout prep: zero-pad + cast ----
    a0_p = pad2(a_blocks[0], dst0_pad, src0_pad).astype(jnp.bfloat16)
    x_p = pad2(x, src0_pad, feat_pad[0]).astype(jnp.bfloat16)
    w_p = [pad2(weights[i], feat_pad[i], feat_pad[i + 1]).astype(jnp.bfloat16)
           for i in range(n_layers)]
    b_p = [pad2(biases[i].reshape(1, -1), 1, feat_pad[i + 1]).astype(jnp.float32)
           for i in range(n_layers)]

    # ---------------- call 1: layer 0 (streamed / tiled) ----------------
    h1_itemsize = 2 if n_layers > 1 else 4
    h1_dtype = jnp.bfloat16 if n_layers > 1 else jnp.float32
    grid1 = (dst0_pad // tm, src0_pad // tk)
    foot1 = (4 * tm * tk                             # A0 tile, 2 buffers, bf16
             + 4 * tk * feat_pad[0]                  # x tile,  2 buffers, bf16
             + 4 * feat_pad[0] * feat_pad[1]         # resident W0
             + 8 * feat_pad[1]                       # resident b0
             + 2 * h1_itemsize * tm * feat_pad[1]    # out tile, 2 buffers
             + 4 * tm * feat_pad[0])                 # f32 accumulator scratch
    vmem1 = int(min(max(2 * foot1, 16 * 2**20), 64 * 2**20))
    flops1 = (2 * dst0_pad * src0_pad * feat_pad[0]
              + 2 * dst0_pad * feat_pad[0] * feat_pad[1])
    bytes1 = (a0_p.size * a0_p.dtype.itemsize + x_p.size * x_p.dtype.itemsize
              + w_p[0].size * w_p[0].dtype.itemsize + b_p[0].size * 4
              + dst0_pad * feat_pad[1] * h1_itemsize)

    h1 = pl.pallas_call(
        functools.partial(_layer0_kernel, apply_relu=(n_layers > 1)),
        grid=grid1,
        out_shape=jax.ShapeDtypeStruct((dst0_pad, feat_pad[1]), h1_dtype),
        in_specs=[
            pl.BlockSpec((tm, tk), lambda m, k: (m, k)),                   # A0 streamed
            pl.BlockSpec((tk, feat_pad[0]), lambda m, k: (k, 0)),          # x  streamed
            pl.BlockSpec((feat_pad[0], feat_pad[1]), lambda m, k: (0, 0)),  # W0 resident
            pl.BlockSpec((1, feat_pad[1]), lambda m, k: (0, 0)),           # b0 resident
        ],
        out_specs=pl.BlockSpec((tm, feat_pad[1]), lambda m, k: (m, 0)),
        scratch_shapes=[pltpu.VMEM((tm, feat_pad[0]), jnp.float32)],
        compiler_params=pltpu.CompilerParams(
            dimension_semantics=("parallel", "arbitrary"),
            vmem_limit_bytes=vmem1),
        cost_estimate=pl.CostEstimate(flops=flops1, transcendentals=0,
                                      bytes_accessed=bytes1),
    )(a0_p, x_p, w_p[0], b_p[0])

    if n_layers == 1:
        return h1[:n_dst[0], :n_classes]

    # ------------- call 2: layers 1..L-1 (tiny, fully resident) ---------
    dst_pad = [dst0_pad] + [_round_up(d, 16) for d in n_dst[1:]]
    a_rest_p = [pad2(a_blocks[i], dst_pad[i], dst_pad[i - 1]).astype(jnp.bfloat16)
                for i in range(1, n_layers)]
    n_tail = n_layers - 1
    operands = [h1, *a_rest_p, *w_p[1:], *b_p[1:]]

    bytes2 = (sum(int(op.size) * op.dtype.itemsize for op in operands)
              + dst_pad[-1] * feat_pad[-1] * 4)
    flops2 = sum(2 * dst_pad[i] * dst_pad[i - 1] * feat_pad[i]
                 + 2 * dst_pad[i] * feat_pad[i] * feat_pad[i + 1]
                 for i in range(1, n_layers))
    vmem2 = int(min(max(2 * bytes2, 16 * 2**20), 64 * 2**20))

    out_pad = pl.pallas_call(
        functools.partial(_tail_kernel, n_tail=n_tail),
        out_shape=jax.ShapeDtypeStruct((dst_pad[-1], feat_pad[-1]), jnp.float32),
        in_specs=[pl.BlockSpec(memory_space=pltpu.MemorySpace.VMEM)
                  for _ in operands],
        out_specs=pl.BlockSpec(memory_space=pltpu.MemorySpace.VMEM),
        compiler_params=pltpu.CompilerParams(vmem_limit_bytes=vmem2),
        cost_estimate=pl.CostEstimate(flops=flops2, transcendentals=0,
                                      bytes_accessed=bytes2),
    )(*operands)
    return out_pad[:n_dst[-1], :n_classes]


def _ref_forward(a_blocks, x, weights, biases, n_classes):
    """Pure-jnp reference mirroring the kernel's precision policy (bf16 ops, f32 accum)."""
    n_layers = len(weights)
    h = x.astype(jnp.bfloat16)
    for i in range(n_layers):
        a = a_blocks[i].astype(jnp.bfloat16)
        w = weights[i].astype(jnp.bfloat16)
        b = biases[i].astype(jnp.float32)
        agg = jnp.dot(a, h, preferred_element_type=jnp.float32)
        z = jnp.dot(agg.astype(jnp.bfloat16), w,
                    preferred_element_type=jnp.float32) + b
        if i != n_layers - 1:
            h = jnp.maximum(z, 0.0).astype(jnp.bfloat16)
        else:
            h = z
    return h[:, :n_classes]


def _make_block(key, n_dst, n_src):
    """Dense symmetric-normalized aggregation matrix for a synthetic MFG block."""
    adj = jax.random.bernoulli(key, p=0.3, shape=(n_dst, n_src)).astype(jnp.float32)
    adj = jnp.minimum(adj + jnp.eye(n_dst, n_src, dtype=jnp.float32), 1.0)
    deg_dst = jnp.clip(jnp.sum(adj, axis=1, keepdims=True), 1.0, None)
    deg_src = jnp.clip(jnp.sum(adj, axis=0, keepdims=True), 1.0, None)
    return adj / jnp.sqrt(deg_dst) / jnp.sqrt(deg_src)


def _make_params(key, in_f, out_f):
    k1, k2 = jax.random.split(key)
    scale = 1.0 / jnp.sqrt(jnp.float32(in_f))
    w = jax.random.normal(k1, (in_f, out_f), jnp.float32) * scale
    b = jax.random.normal(k2, (out_f,), jnp.float32) * 0.01
    return w, b


if __name__ == "__main__":
    # Small, deterministic problem: 3-layer NSGCN (GraphConv stack).
    in_feats, n_hidden, n_classes, n_layers = 16, 32, 8, 3
    node_counts = [64, 32, 16, 8]  # src of block0 -> dst of block0 == src of block1 -> ...

    root = jax.random.PRNGKey(0)
    k_x, k_b, k_p = jax.random.split(root, 3)

    x = jax.random.normal(k_x, (node_counts[0], in_feats), jnp.float32)

    block_keys = jax.random.split(k_b, n_layers)
    a_blocks = [_make_block(block_keys[i], node_counts[i + 1], node_counts[i])
                for i in range(n_layers)]

    feat_dims = [in_feats] + [n_hidden] * (n_layers - 1) + [n_classes]
    param_keys = jax.random.split(k_p, n_layers)
    weights, biases = [], []
    for i in range(n_layers):
        w, b = _make_params(param_keys[i], feat_dims[i], feat_dims[i + 1])
        weights.append(w)
        biases.append(b)

    out = nsgcn_forward(a_blocks, x, weights, biases, n_classes)
    out = jax.block_until_ready(out)

    ref = _ref_forward(a_blocks, x, weights, biases, n_classes)
    assert out.shape == (node_counts[-1], n_classes)
    assert jnp.allclose(out, ref, atol=2e-2, rtol=2e-2)

    print("KERNEL_OK")
</pallas_src>

<mosaic_0001>
module attributes {stable_mosaic.version = 11 : i64} {
  func.func @_layer0_kernel(%arg0: i32, %arg1: i32, %arg2: memref<32x128xbf16, #tpu.memory_space<vmem>>, %arg3: memref<128x128xbf16, #tpu.memory_space<vmem>>, %arg4: memref<128x128xbf16, #tpu.memory_space<vmem>>, %arg5: memref<1x128xf32, #tpu.memory_space<vmem>>, %arg6: memref<32x128xbf16, #tpu.memory_space<vmem>>, %arg7: memref<32x128xf32, #tpu.memory_space<vmem>>) attributes {dimension_semantics = [#tpu.dimension_semantics<parallel>, #tpu.dimension_semantics<arbitrary>], iteration_bounds = array<i64: 1, 1>, scalar_prefetch = 0 : i64, scratch_operands = 1 : i64, tpu.core_type = #tpu.core_type<tc>, window_params = [{transform_indices = @transform_0, window_bounds = array<i64: 32, 128>}, {transform_indices = @transform_1, window_bounds = array<i64: 128, 128>}, {pipeline_mode = #tpu.pipeline_mode<synchronous>, transform_indices = @transform_2, window_bounds = array<i64: 128, 128>}, {pipeline_mode = #tpu.pipeline_mode<synchronous>, transform_indices = @transform_3, window_bounds = array<i64: 1, 128>}, {transform_indices = @transform_4, window_bounds = array<i64: 32, 128>}]} {
    %c0_i32 = arith.constant 0 : i32
    %0 = arith.cmpi eq, %arg1, %c0_i32 : i32
    %1 = arith.extui %0 : i1 to i32
    %c0_i32_0 = arith.constant 0 : i32
    %2 = arith.cmpi ne, %1, %c0_i32_0 : i32
    scf.if %2 {
      %cst_10 = arith.constant 0.000000e+00 : f32
      %12 = vector.broadcast %cst_10 : f32 to vector<32x128xf32>
      %c0_11 = arith.constant 0 : index
      %c0_12 = arith.constant 0 : index
      %13 = vector.load %arg7[%c0_11, %c0_12] : memref<32x128xf32, #tpu.memory_space<vmem>>, vector<32x128xf32>
      tpu.vector_store %arg7[%c0_11, %c0_12], %12 {strides = array<i32>} : memref<32x128xf32, #tpu.memory_space<vmem>>, vector<32x128xf32>,
    } else {
    }
    %c0 = arith.constant 0 : index
    %c0_1 = arith.constant 0 : index
    %3 = vector.load %arg7[%c0, %c0_1] : memref<32x128xf32, #tpu.memory_space<vmem>>, vector<32x128xf32>
    %c0_2 = arith.constant 0 : index
    %c0_3 = arith.constant 0 : index
    %4 = vector.load %arg2[%c0_2, %c0_3] : memref<32x128xbf16, #tpu.memory_space<vmem>>, vector<32x128xbf16>
    %c0_4 = arith.constant 0 : index
    %c0_5 = arith.constant 0 : index
    %5 = vector.load %arg3[%c0_4, %c0_5] : memref<128x128xbf16, #tpu.memory_space<vmem>>, vector<128x128xbf16>
    %cst = arith.constant dense<0.000000e+00> : vector<32x128xf32>
    %6 = tpu.matmul %4, %5, %cst {dimension_numbers = #tpu.dot_dimension_numbers<[1], [0], [0], [1], [0, 0, 1, 1], [], []>} : vector<32x128xbf16>, vector<128x128xbf16>, vector<32x128xf32> -> vector<32x128xf32>
    %7 = arith.addf %3, %6 : vector<32x128xf32>
    %c0_6 = arith.constant 0 : index
    %c0_7 = arith.constant 0 : index
    %8 = vector.load %arg7[%c0_6, %c0_7] : memref<32x128xf32, #tpu.memory_space<vmem>>, vector<32x128xf32>
    tpu.vector_store %arg7[%c0_6, %c0_7], %7 {strides = array<i32>} : memref<32x128xf32, #tpu.memory_space<vmem>>, vector<32x128xf32>,
    %c0_i32_8 = arith.constant 0 : i32
    %9 = arith.cmpi eq, %arg1, %c0_i32_8 : i32
    %10 = arith.extui %9 : i1 to i32
    %c0_i32_9 = arith.constant 0 : i32
    %11 = arith.cmpi ne, %10, %c0_i32_9 : i32
    scf.if %11 {
      %c0_10 = arith.constant 0 : index
      %c0_11 = arith.constant 0 : index
      %12 = vector.load %arg7[%c0_10, %c0_11] : memref<32x128xf32, #tpu.memory_space<vmem>>, vector<32x128xf32>
      %13 = arith.truncf %12 : vector<32x128xf32> to vector<32x128xbf16>
      %c0_12 = arith.constant 0 : index
      %c0_13 = arith.constant 0 : index
      %14 = vector.load %arg4[%c0_12, %c0_13] : memref<128x128xbf16, #tpu.memory_space<vmem>>, vector<128x128xbf16>
      %cst_14 = arith.constant dense<0.000000e+00> : vector<32x128xf32>
      %15 = tpu.matmul %13, %14, %cst_14 {dimension_numbers = #tpu.dot_dimension_numbers<[1], [0], [0], [1], [0, 0, 1, 1], [], []>} : vector<32x128xbf16>, vector<128x128xbf16>, vector<32x128xf32> -> vector<32x128xf32>
      %c0_15 = arith.constant 0 : index
      %c0_16 = arith.constant 0 : index
      %16 = vector.load %arg5[%c0_15, %c0_16] : memref<1x128xf32, #tpu.memory_space<vmem>>, vector<1x128xf32>
      %17 = vector.broadcast %16 : vector<1x128xf32> to vector<32x128xf32>
      %18 = arith.addf %15, %17 : vector<32x128xf32>
      %cst_17 = arith.constant 0.000000e+00 : f32
      %19 = vector.broadcast %cst_17 : f32 to vector<32x128xf32>
      %20 = arith.maximumf %18, %19 : vector<32x128xf32>
      %21 = arith.truncf %20 : vector<32x128xf32> to vector<32x128xbf16>
      %c0_18 = arith.constant 0 : index
      %c0_19 = arith.constant 0 : index
      %22 = vector.load %arg6[%c0_18, %c0_19] : memref<32x128xbf16, #tpu.memory_space<vmem>>, vector<32x128xbf16>
      tpu.vector_store %arg6[%c0_18, %c0_19], %21 {strides = array<i32>} : memref<32x128xbf16, #tpu.memory_space<vmem>>, vector<32x128xbf16>,
    } else {
    }
    return
  }
  func.func @transform_0(%arg0: i32, %arg1: i32) -> (i32, i32) {
    %c0_i32 = arith.constant 0 : i32
    return %arg0, %arg1 : i32, i32
  }
  func.func @transform_1(%arg0: i32, %arg1: i32) -> (i32, i32) {
    %c0_i32 = arith.constant 0 : i32
    %c0_i32_0 = arith.constant 0 : i32
    return %arg1, %c0_i32 : i32, i32
  }
  func.func @transform_2(%arg0: i32, %arg1: i32) -> (i32, i32) {
    %c0_i32 = arith.constant 0 : i32
    %c0_i32_0 = arith.constant 0 : i32
    %c0_i32_1 = arith.constant 0 : i32
    return %c0_i32, %c0_i32_0 : i32, i32
  }
  func.func @transform_3(%arg0: i32, %arg1: i32) -> (i32, i32) {
    %c0_i32 = arith.constant 0 : i32
    %c0_i32_0 = arith.constant 0 : i32
    %c0_i32_1 = arith.constant 0 : i32
    return %c0_i32, %c0_i32_0 : i32, i32
  }
  func.func @transform_4(%arg0: i32, %arg1: i32) -> (i32, i32) {
    %c0_i32 = arith.constant 0 : i32
    %c0_i32_0 = arith.constant 0 : i32
    return %arg0, %c0_i32 : i32, i32
  }
}

</mosaic_0001>

<bundles_post_ra>
// kernel: tpu_custom_call.1
= control target key start
LH: loop header
LB: loop body
LE: loop exit
PB: predicated region body
PF: predicated region fallthrough
CT: control target
= control target key end

     0   :  { %9 = vsyncpa [#allocation4], 0  ;;  %s697_s0 = inlined_call_operand.hbm [shape: bf16[32,128], index: 0, kind: input, shape index: {}]   ;;  %s698_s1 = inlined_call_operand.hbm [shape: bf16[128,128], index: 1, kind: input, shape index: {}]   ;;  %s699_s2 = inlined_call_operand.hbm [shape: bf16[128,128], index: 2, kind: input, shape index: {}]   ;;  %s700_s3 = inlined_call_operand.vmem [shape: f32[1,128], index: 3, kind: input, shape index: {}]   ;;  %s701_s4 = inlined_call_operand.hbm [shape: bf16[32,128], index: 4, kind: output, shape index: {}]  }
   0x1   :  { %10 = vsyncpa [#allocation7], 0 }
   0x2   :  { %11 = vsyncpa [#allocation5], 0  ;;  %s596_s15 = smov [#allocation6]   ;;  %s597_s17 = smov [#allocation3]  }
   0x3   :  { %s29_s16 = sshll.u32 %s596_s15, 4  ;;  %s17_s18 = sshll.u32 %s597_s17, 4  ;;  %s30_s16 = int_to_ptr.vmem [resolvable:$true] %s29_s16  ;;  %s627_s18 = int_to_ptr.vmem [resolvable:$true] %s17_s18 }
   0x4   :  { %s502_s21 = scalar_lea.hbm %s698_s1, 1024 }
   0x5   :  { %p503_p0 = scmp.ne.s32.totalorder %s698_s1, %s502_s21  ;;  %p506_p1 = scmp.lt.u32.totalorder %s502_s21, %s698_s1 }
   0x7   :  { %p508_p2 = pnand %p506_p1, %p503_p0 }
   0x9   :  { %511 = shalt.err (!%p508_p2)
}
   0xa   :  { %s512_s26 = scalar_lea.vmem %s30_s16, 1024  ;;  %p517_p4 = scmp.lt.s32.totalorder %s30_s16, %s30_s16 }
   0xb   :  { %p513_p3 = scmp.ne.s32.totalorder %s30_s16, %s512_s26  ;;  %p518_p5 = scmp.lt.s32.totalorder %s512_s26, %s512_s26 }
   0xd   :  { %p519_p6 = por %p518_p5, %p517_p4 }
   0xf   :  { %p520_p7 = pnand %p519_p6, %p513_p3 }
  0x11   :  { %523 = shalt.err (!%p520_p7)
}
  0x12   :  { %s598_s27 = smov 64   ;;  %s599_s28 = smov 4  }
  0x13   :  { %35 = dma.hbm_to_vmem [thread:$0]  %s698_s1, 1024, %s30_s16, [#allocation7], %s598_s27, %s598_s27, %s599_s28  }
  0x14   :  { %s524_s7 = scalar_lea.hbm %s697_s0, 256 }
  0x15   :  { %p525_p8 = scmp.ne.s32.totalorder %s697_s0, %s524_s7  ;;  %p528_p9 = scmp.lt.u32.totalorder %s524_s7, %s697_s0 }
  0x17   :  { %p530_p10 = pnand %p528_p9, %p525_p8 }
  0x19   :  { %533 = shalt.err (!%p530_p10)
}
  0x1a   :  { %s534_s12 = scalar_lea.vmem %s627_s18, 256  ;;  %p539_p12 = scmp.lt.s32.totalorder %s627_s18, %s627_s18 }
  0x1b   :  { %p535_p11 = scmp.ne.s32.totalorder %s627_s18, %s534_s12  ;;  %p540_p13 = scmp.lt.s32.totalorder %s534_s12, %s534_s12 }
  0x1d   :  { %p541_p0 = por %p540_p13, %p539_p12 }
  0x1f   :  { %p542_p1 = pnand %p541_p0, %p535_p11 }
  0x21   :  { %545 = shalt.err (!%p542_p1)
}
  0x22   :  { %23 = dma.hbm_to_vmem [thread:$0]  %s697_s0, 256, %s627_s18, [#allocation4], %s598_s27, %s598_s27, %s599_s28  }
  0x23   :  { %s600_s14 = smov [#allocation8]   ;;  %s546_s19 = scalar_lea.hbm %s699_s2, 1024 }
  0x24   :  { %s41_s15 = sshll.u32 %s600_s14, 4  ;;  %p547_p2 = scmp.ne.s32.totalorder %s699_s2, %s546_s19  ;;  %s42_s15 = int_to_ptr.vmem [resolvable:$true] %s41_s15 }
  0x25   :  { %p550_p3 = scmp.lt.u32.totalorder %s546_s19, %s699_s2 }
  0x27   :  { %p552_p4 = pnand %p550_p3, %p547_p2 }
  0x29   :  { %555 = shalt.err (!%p552_p4)
}
  0x2a   :  { %s556_s24 = scalar_lea.vmem %s42_s15, 1024  ;;  %p561_p6 = scmp.lt.s32.totalorder %s42_s15, %s42_s15 }
  0x2b   :  { %p557_p5 = scmp.ne.s32.totalorder %s42_s15, %s556_s24  ;;  %p562_p7 = scmp.lt.s32.totalorder %s556_s24, %s556_s24 }
  0x2d   :  { %p563_p8 = por %p562_p7, %p561_p6 }
  0x2f   :  { %p564_p9 = pnand %p563_p8, %p557_p5 }
  0x31   :  { %567 = shalt.err (!%p564_p9)
}
  0x32   :  { %47 = dma.hbm_to_vmem [thread:$0]  %s699_s2, 1024, %s42_s15, [#allocation7], %s598_s27, %s598_s27, %s599_s28  }
  0x33   :  { %590 = dma.done.wait [#allocation4], 256  }
  0x34   :  { %591 = vsyncadd [#allocation4], 4294967040 }
  0x35   :  { %592 = dma.done.wait [#allocation7], 2048  }
  0x36   :  { %593 = vsyncadd [#allocation7], 4294965248  ;;  %v484_v0 = vld [vmem:[#allocation6] sm:$0xff]   ;;  %v485_v1 = vld [vmem:[#allocation6 + $0x8] sm:$0xff]   ;;  %s601_s26 = smov [#allocation9]  }
  0x37   :  { %438 = vmatprep.subr.bf16.mxu0 %v484_v0  ;;  %v486_v2 = vld [vmem:[#allocation6 + $0x10] sm:$0xff]   ;;  %v487_v3 = vld [vmem:[#allocation6 + $0x18] sm:$0xff]   ;;  %v494_v5 = vld [vmem:[#allocation8] sm:$0xff]   ;;  %s367_s29 = sshll.u32 %s601_s26, 4  ;;  %s368_s29 = int_to_ptr.vmem [resolvable:$true] %s367_s29 }
  0x38   :  { %439 = vmatpush3.bf16.msra.mxu0 %v484_v0  ;;  %v492_v4 = vld [vmem:[#allocation3] sm:$0xff]   ;;  %v495_v6 = vld [vmem:[#allocation8 + $0x8] sm:$0xff]   ;;  %v488_v7 = vld [vmem:[#allocation6 + $0x20] sm:$0xff]   ;;  %458 = vmatprep.subr.bf16.mxu1 %v494_v5  ;;  %p573_p11 = scmp.lt.s32.totalorder %s368_s29, %s368_s29 }
  0x39   :  { %440 = vmatprep.subr.bf16.mxu0 %v485_v1  ;;  %454 = vmatprep.mubr.bf16.mxu0 %v492_v4  ;;  %v496_v8 = vld [vmem:[#allocation8 + $0x10] sm:$0xff]   ;;  %v489_v9 = vld [vmem:[#allocation6 + $0x28] sm:$0xff]   ;;  %v497_v10 = vld [vmem:[#allocation8 + $0x18] sm:$0xff]  }
  0x3a   :  { %459 = vmatpush3.bf16.msra.mxu1 %v494_v5  ;;  %v490_v11 = vld [vmem:[#allocation6 + $0x30] sm:$0xff]   ;;  %v498_v12 = vld [vmem:[#allocation8 + $0x20] sm:$0xff]   ;;  %v491_v13 = vld [vmem:[#allocation6 + $0x38] sm:$0xff]  }
  0x3b   :  { %460 = vmatprep.subr.bf16.mxu1 %v495_v6  ;;  %v499_v14 = vld [vmem:[#allocation8 + $0x28] sm:$0xff]   ;;  %v493_v15 = vld [vmem:[#allocation3 + $0x8] sm:$0xff]   ;;  %v500_v16 = vld [vmem:[#allocation8 + $0x30] sm:$0xff]  }
  0x3c   :  { %441 = vmatpush3.bf16.msra.mxu0 %v485_v1  ;;  %v501_v17 = vld [vmem:[#allocation8 + $0x38] sm:$0xff]   ;;  %v390_v24 = vld [vmem:[%s700_s3] ss:$0 sm:$0xff]  ;;  %s568_s3 = scalar_lea.vmem %s368_s29, 256 }
  0x3d   :  { %442 = vmatprep.subr.bf16.mxu0 %v486_v2  ;;  %p569_p10 = scmp.ne.s32.totalorder %s368_s29, %s568_s3  ;;  %p574_p12 = scmp.lt.s32.totalorder %s568_s3, %s568_s3 }
  0x3e   :  { %461 = vmatpush3.bf16.msra.mxu1 %v495_v6 }
  0x3f   :  { %462 = vmatprep.subr.bf16.mxu1 %v496_v8  ;;  %p575_p13 = por %p574_p12, %p573_p11 }
  0x40   :  { %443 = vmatpush3.bf16.msra.mxu0 %v486_v2 }
  0x41   :  { %444 = vmatprep.subr.bf16.mxu0 %v487_v3  ;;  %p576_p0 = pnand %p575_p13, %p569_p10 }
  0x42   :  { %463 = vmatpush3.bf16.msra.mxu1 %v496_v8 }
  0x43   :  { %464 = vmatprep.subr.bf16.mxu1 %v497_v10 }
  0x44   :  { %445 = vmatpush3.bf16.msra.mxu0 %v487_v3 }
  0x45   :  { %446 = vmatprep.subr.bf16.mxu0 %v488_v7 }
  0x46   :  { %465 = vmatpush3.bf16.msra.mxu1 %v497_v10 }
  0x47   :  { %466 = vmatprep.subr.bf16.mxu1 %v498_v12 }
  0x48   :  { %447 = vmatpush3.bf16.msra.mxu0 %v488_v7 }
  0x49   :  { %448 = vmatprep.subr.bf16.mxu0 %v489_v9 }
  0x4a   :  { %467 = vmatpush3.bf16.msra.mxu1 %v498_v12 }
  0x4b   :  { %468 = vmatprep.subr.bf16.mxu1 %v499_v14 }
  0x4c   :  { %449 = vmatpush3.bf16.msra.mxu0 %v489_v9 }
  0x4d   :  { %450 = vmatprep.subr.bf16.mxu0 %v490_v11 }
  0x4e   :  { %469 = vmatpush3.bf16.msra.mxu1 %v499_v14 }
  0x4f   :  { %470 = vmatprep.subr.bf16.mxu1 %v500_v16 }
  0x50   :  { %451 = vmatpush3.bf16.msra.mxu0 %v490_v11 }
  0x51   :  { %452 = vmatprep.subr.bf16.mxu0 %v491_v13 }
  0x52   :  { %471 = vmatpush3.bf16.msra.mxu1 %v500_v16 }
  0x53   :  { %472 = vmatprep.subr.bf16.mxu1 %v501_v17 }
  0x54   :  { %453 = vmatpush3.bf16.msra.mxu0 %v491_v13 }
  0x56   :  { %473 = vmatpush3.bf16.msra.mxu1 %v501_v17 }
  0x57   :  { %455 = vmatmul.mubr.bf16.vlgmr.msra.gmra.mrb[0].mxu0 %v493_v15 }
 0x12a   :  { %v456_v18 = vpop.f32.mrb[0].mxu0 }
 0x12b   :  { %v186_v19 = vpop.f32.mrb[1].mxu0 }
 0x12c   :  { %v457_v20 = vpop.f32.mrb[2].mxu0 }
 0x12d   :  { %v217_v21 = vpack.c.bf16 %v457_v20, %v456_v18  ;;  %v189_v22 = vpop.f32.mrb[3].mxu0 }
 0x12e   :  { %v216_v23 = vpack.c.bf16 %v189_v22, %v186_v19 }
 0x130   :  { %474 = vmatprep.mubr.bf16.mxu1 %v216_v23 }
 0x131   :  { %475 = vmatmul.mubr.bf16.vlgmr.msra.gmra.mrb[0].mxu1 %v217_v21 }
 0x204   :  { %v476_v25 = vpop.f32.mrb[0].mxu1 }
 0x205   :  { %v332_v26 = vadd.f32 %v476_v25, %v390_v24  ;;  %v323_v27 = vpop.f32.mrb[1].mxu1 }
 0x206   :  { %v324_v28 = vadd.f32 %v390_v24, %v323_v27  ;;  %v477_v29 = vpop.f32.mrb[2].mxu1 }
 0x207   :  { %v335_v30 = vadd.f32 %v477_v29, %v390_v24  ;;  %v326_v31 = vpop.f32.mrb[3].mxu1  ;;  %v340_v33 = vmax.f32 %v332_v26, 0.0 }
 0x208   :  { %v327_v32 = vadd.f32 %v390_v24, %v326_v31  ;;  %v338_v35 = vmax.f32 %v324_v28, 0.0 }
 0x209   :  { %v341_v34 = vmax.f32 %v335_v30, 0.0 }
 0x20a   :  { %v339_v36 = vmax.f32 %v327_v32, 0.0 }
 0x20b   :  { %v415_v37 = vpack.c.bf16 %v341_v34, %v340_v33 }
 0x20c   :  { %v410_v38 = vpack.c.bf16 %v339_v36, %v338_v35 }
 0x20d   :  { %417 = vst [vmem:[#allocation9 + $0x8] sm:$0xff] %v415_v37  }
 0x20e   :  { %411 = vst [vmem:[#allocation9] sm:$0xff] %v410_v38  }
 0x20f   :  { %579 = shalt.err (!%p576_p0)
}
 0x210   :  { %s580_s6 = scalar_lea.hbm %s701_s4, 256 }
 0x211   :  { %p581_p1 = scmp.ne.s32.totalorder %s701_s4, %s580_s6  ;;  %p584_p2 = scmp.lt.u32.totalorder %s580_s6, %s701_s4 }
 0x213   :  { %p586_p3 = pnand %p584_p2, %p581_p1 }
 0x215   :  { %589 = shalt.err (!%p586_p3)
}
 0x216   :  { %373 = dma.vmem_to_hbm [thread:$0]  %s368_s29, 256, %s701_s4, [#allocation5], %s598_s27, %s598_s27, %s599_s28  }
 0x217   :  { %594 = dma.done.wait [#allocation5], 256  }
 0x218   :  { %595 = vsyncadd [#allocation5], 4294967040 }
 0x219   :  { %377 = vsyncpa [#allocation4], 1 }
 0x21a   :  { %378 = vsyncpa [#allocation7], 1 }
 0x21b   :  { %379 = vsyncpa [#allocation5], 1 }

</bundles_post_ra>
